<compile_context>
chip_gen: v7x
topology: tpu7x:2x2x1
jax: 0.10.0
libtpu: 0.0.40
codegen_flags: <defaults>
</compile_context>

<pallas_src>
import functools

import jax
import jax.numpy as jnp
from jax.experimental import pallas as pl
from jax.experimental.pallas import tpu as pltpu


def _yolo_loss_kernel(pred_ref, tgt_ref, aux_ref, out_ref, stack_ref, *, cell):
    # pred_ref/tgt_ref: (D, BLOCK)  channel-major, cells on lanes.
    # aux_ref:          (8, BLOCK)  rows: 0=tie-break, 1=c*cell, 2=r*cell, 3=valid.
    # out_ref:          (16, 1)     resident accumulator (sums 0..7, cnt1, cnt2, cntn).
    # stack_ref:        (16, BLOCK) VMEM scratch of per-cell contributions.
    @pl.when(pl.program_id(0) == 0)
    def _init():
        out_ref[...] = jnp.zeros_like(out_ref)
        stack_ref[...] = jnp.zeros_like(stack_ref)   # rows 11..15 stay zero

    p = pred_ref[...]
    t = tgt_ref[...]
    a = aux_ref[...]

    rand = a[0:1, :]
    cx_off = a[1:2, :]
    cy_off = a[2:3, :]
    valid = a[3:4, :]

    def corners(tx, ty, w, h):
        cx = tx * cell + cx_off
        cy = ty * cell + cy_off
        w2 = jnp.floor((w * w) * 0.5)   # torch float `// 2` after squaring
        h2 = jnp.floor((h * h) * 0.5)
        return cx - w2, cy - h2, cx + w2, cy + h2

    def iou(b1, b2):
        ix1 = jnp.maximum(b1[0], b2[0])
        iy1 = jnp.maximum(b1[1], b2[1])
        ix2 = jnp.minimum(b1[2], b2[2])
        iy2 = jnp.minimum(b1[3], b2[3])
        inter = jnp.maximum(0.0, ix2 - ix1 + 1.0) * jnp.maximum(0.0, iy2 - iy1 + 1.0)
        a1 = (b1[2] - b1[0] + 1.0) * (b1[3] - b1[1] + 1.0)
        a2 = (b2[2] - b2[0] + 1.0) * (b2[3] - b2[1] + 1.0)
        return inter / (a1 + a2 - inter)

    # Both "predicted boxes" read pred[..., :4] in the reference, so the two IOUs
    # are bit-identical: compute once and reuse (bit-exact dedup).
    p_box = corners(p[0:1, :], p[1:2, :], p[2:3, :], p[3:4, :])
    g_box = corners(t[0:1, :], t[1:2, :], t[2:3, :], t[3:4, :])
    iou1 = iou(p_box, g_box)
    iou2 = iou1

    obj = t[4:5, :] > 0.0
    choose1 = (iou1 > iou2) | ((iou1 == iou2) & (rand > 0.5))

    t4 = jnp.where(obj & jnp.logical_not(choose1), 0.0, t[4:5, :])
    t9 = jnp.where(obj & choose1, 0.0, t[9:10, :])

    m1 = (t4 > 0.0).astype(jnp.float32)                               # box-1 responsible
    m2 = (t9 > 0.0).astype(jnp.float32)                               # box-2 responsible
    mn = ((t4 == 0.0) & (t9 == 0.0)).astype(jnp.float32) * valid      # no-object (real cells)

    # Per-cell squared errors, summed over the relevant channel groups (sublane reduce).
    d_loc1 = p[0:4, :] - t[0:4, :]
    loc1_sq = jnp.sum(d_loc1 * d_loc1, axis=0, keepdims=True)
    d_loc2 = p[5:9, :] - t[5:9, :]
    loc2_sq = jnp.sum(d_loc2 * d_loc2, axis=0, keepdims=True)
    d_cls = p[10:, :] - t[10:, :]                                     # class diff computed once
    cls_sq = jnp.sum(d_cls * d_cls, axis=0, keepdims=True)
    d4 = p[4:5, :] - t4
    d4_sq = d4 * d4
    d9 = p[9:10, :] - t9
    d9_sq = d9 * d9

    # Stack the masked per-cell contributions; one fused lane reduction below.
    stack_ref[0:1, :] = m1 * loc1_sq
    stack_ref[1:2, :] = m2 * loc2_sq
    stack_ref[2:3, :] = m1 * d4_sq
    stack_ref[3:4, :] = m2 * d9_sq
    stack_ref[4:5, :] = m1 * cls_sq
    stack_ref[5:6, :] = m2 * cls_sq
    stack_ref[6:7, :] = mn * d4_sq
    stack_ref[7:8, :] = mn * d9_sq
    stack_ref[8:9, :] = m1
    stack_ref[9:10, :] = m2
    stack_ref[10:11, :] = mn

    out_ref[...] += jnp.sum(stack_ref[...], axis=1, keepdims=True)


def yolo_loss(pred, target, tie_break_keep1, *, img_size, S, B, C, l_coord, l_noobj):
    batch = pred.shape[0]
    D = 5 * B + C
    N = batch * S * S
    cell = float(img_size // S)   # reference uses integer floor division

    # Lane block: multiple of 128, capped at 2048 rows per grid step.
    BLOCK = min(2048, ((N + 127) // 128) * 128)
    num_blocks = (N + BLOCK - 1) // BLOCK
    Npad = num_blocks * BLOCK
    pad = Npad - N

    pred_f = pred.reshape(N, D).astype(jnp.float32)
    tgt_f = target.reshape(N, D).astype(jnp.float32)

    # Precompute per-cell metadata in the wrapper (no int div/mod in the kernel).
    n_idx = jnp.arange(N, dtype=jnp.int32)
    c_idx = ((n_idx % (S * S)) // S).astype(jnp.float32)
    r_idx = (n_idx % S).astype(jnp.float32)
    aux = jnp.stack(
        [
            tie_break_keep1.reshape(N).astype(jnp.float32),
            c_idx * cell,
            r_idx * cell,
            jnp.ones((N,), jnp.float32),               # valid flag (0 for padding)
        ]
        + [jnp.zeros((N,), jnp.float32)] * 4,
        axis=0,
    )                                                   # (8, N)

    # Channel-major, lane-dense slabs.
    pred_t = jnp.pad(pred_f, ((0, pad), (0, 0))).T      # (D, Npad)
    tgt_t = jnp.pad(tgt_f, ((0, pad), (0, 0))).T        # (D, Npad)
    aux_p = jnp.pad(aux, ((0, 0), (0, pad)))            # (8, Npad)

    kernel = functools.partial(_yolo_loss_kernel, cell=cell)
    out = pl.pallas_call(
        kernel,
        out_shape=jax.ShapeDtypeStruct((16, 1), jnp.float32),
        grid_spec=pltpu.PrefetchScalarGridSpec(
            num_scalar_prefetch=0,
            grid=(num_blocks,),
            in_specs=[
                pl.BlockSpec((D, BLOCK), lambda i: (0, i)),
                pl.BlockSpec((D, BLOCK), lambda i: (0, i)),
                pl.BlockSpec((8, BLOCK), lambda i: (0, i)),
            ],
            out_specs=pl.BlockSpec((16, 1), lambda i: (0, 0)),
            scratch_shapes=[pltpu.VMEM((16, BLOCK), jnp.float32)],
        ),
        compiler_params=pltpu.CompilerParams(
            dimension_semantics=("arbitrary",),
            vmem_limit_bytes=64 * 1024 * 1024,
        ),
    )(pred_t, tgt_t, aux_p)

    res = out[:, 0]
    cnt1, cnt2, cntn = res[8], res[9], res[10]

    # MSELoss(mean) = sum of squared diffs / element count per masked selection.
    # NOTE: faithful to torch.nn.MSELoss on empty selections (NaN if a mask is empty).
    loc_loss = res[0] / (4.0 * cnt1) + res[1] / (4.0 * cnt2)
    obj_loss = res[2] / cnt1 + res[3] / cnt2
    cls_loss = res[4] / (float(C) * cnt1) + res[5] / (float(C) * cnt2)
    noobj_loss = res[6] / cntn + res[7] / cntn

    return (l_coord * loc_loss / batch,
            cls_loss / batch,
            obj_loss / batch,
            l_noobj * noobj_loss / batch)


if __name__ == "__main__":
    # Small YOLO-style configuration.
    img_size, S, B, C = 64, 4, 2, 6
    l_coord, l_noobj = 5.0, 0.5
    batch = 2
    D = 5 * B + C          # 16
    N = batch * S * S      # 32

    key = jax.random.PRNGKey(0)
    k_pred, _ = jax.random.split(key)

    pred = jax.random.uniform(k_pred, (batch, S, S, D), dtype=jnp.float32)

    # Deterministic synthetic target: a few cells contain objects
    # (tx, ty, sqrt-w, sqrt-h, conf=1 for both boxes, one-hot class).
    target = jnp.zeros((batch, S, S, D), dtype=jnp.float32)
    obj_cells = [(0, 0, 1), (0, 1, 2), (0, 2, 3), (1, 0, 3), (1, 1, 1), (1, 3, 0)]
    for (b, ci, ri) in obj_cells:
        box = jnp.array([0.5, 0.5, 3.0, 2.0], dtype=jnp.float32)
        target = target.at[b, ci, ri, 0:4].set(box)
        target = target.at[b, ci, ri, 4].set(1.0)
        target = target.at[b, ci, ri, 5:9].set(box)
        target = target.at[b, ci, ri, 9].set(1.0)
        target = target.at[b, ci, ri, 10 + (ci + ri) % C].set(1.0)

    # TODO(synk): random.random() tie-break has no exact Pallas equivalent;
    # replaced with deterministic per-cell bits fed into the kernel.
    tie_break_keep1 = (jnp.arange(N) % 2).astype(jnp.float32)

    losses = yolo_loss(pred, target, tie_break_keep1,
                       img_size=img_size, S=S, B=B, C=C,
                       l_coord=l_coord, l_noobj=l_noobj)
    losses = jax.block_until_ready(losses)
    print("KERNEL_OK")
</pallas_src>

<mosaic_0001>
module attributes {stable_mosaic.version = 11 : i64} {
  func.func @_yolo_loss_kernel(%arg0: i32, %arg1: memref<16x128xf32, #tpu.memory_space<vmem>>, %arg2: memref<16x128xf32, #tpu.memory_space<vmem>>, %arg3: memref<8x128xf32, #tpu.memory_space<vmem>>, %arg4: memref<16x1xf32, #tpu.memory_space<vmem>>, %arg5: memref<16x128xf32, #tpu.memory_space<vmem>>) attributes {dimension_semantics = [#tpu.dimension_semantics<arbitrary>], iteration_bounds = array<i64: 1>, scalar_prefetch = 0 : i64, scratch_operands = 1 : i64, tpu.core_type = #tpu.core_type<tc>, window_params = [{transform_indices = @transform_0, window_bounds = array<i64: 16, 128>}, {transform_indices = @transform_1, window_bounds = array<i64: 16, 128>}, {transform_indices = @transform_2, window_bounds = array<i64: 8, 128>}, {pipeline_mode = #tpu.pipeline_mode<synchronous>, transform_indices = @transform_3, window_bounds = array<i64: 16, 1>}]} {
    %c0_i32 = arith.constant 0 : i32
    %0 = arith.cmpi eq, %arg0, %c0_i32 : i32
    %1 = arith.extui %0 : i1 to i32
    %c0_i32_0 = arith.constant 0 : i32
    %2 = arith.cmpi ne, %1, %c0_i32_0 : i32
    scf.if %2 {
      %cst_52 = arith.constant 0.000000e+00 : f32
      %169 = vector.broadcast %cst_52 : f32 to vector<16x1xf32>
      %c0_53 = arith.constant 0 : index
      %c0_54 = arith.constant 0 : index
      %170 = vector.load %arg4[%c0_53, %c0_54] : memref<16x1xf32, #tpu.memory_space<vmem>>, vector<16x1xf32>
      tpu.vector_store %arg4[%c0_53, %c0_54], %169 {strides = array<i32>} : memref<16x1xf32, #tpu.memory_space<vmem>>, vector<16x1xf32>,
      %cst_55 = arith.constant 0.000000e+00 : f32
      %171 = vector.broadcast %cst_55 : f32 to vector<16x128xf32>
      %c0_56 = arith.constant 0 : index
      %c0_57 = arith.constant 0 : index
      %172 = vector.load %arg5[%c0_56, %c0_57] : memref<16x128xf32, #tpu.memory_space<vmem>>, vector<16x128xf32>
      tpu.vector_store %arg5[%c0_56, %c0_57], %171 {strides = array<i32>} : memref<16x128xf32, #tpu.memory_space<vmem>>, vector<16x128xf32>,
    } else {
    }
    %c0 = arith.constant 0 : index
    %c0_1 = arith.constant 0 : index
    %3 = vector.load %arg1[%c0, %c0_1] : memref<16x128xf32, #tpu.memory_space<vmem>>, vector<16x128xf32>
    %c0_2 = arith.constant 0 : index
    %c0_3 = arith.constant 0 : index
    %4 = vector.load %arg2[%c0_2, %c0_3] : memref<16x128xf32, #tpu.memory_space<vmem>>, vector<16x128xf32>
    %c0_4 = arith.constant 0 : index
    %c0_5 = arith.constant 0 : index
    %5 = vector.load %arg3[%c0_4, %c0_5] : memref<8x128xf32, #tpu.memory_space<vmem>>, vector<8x128xf32>
    %6 = vector.extract_strided_slice %5 {offsets = [0, 0], sizes = [1, 128], strides = [1, 1]} : vector<8x128xf32> to vector<1x128xf32>
    %7 = vector.extract_strided_slice %5 {offsets = [1, 0], sizes = [1, 128], strides = [1, 1]} : vector<8x128xf32> to vector<1x128xf32>
    %8 = vector.extract_strided_slice %5 {offsets = [2, 0], sizes = [1, 128], strides = [1, 1]} : vector<8x128xf32> to vector<1x128xf32>
    %9 = vector.extract_strided_slice %5 {offsets = [3, 0], sizes = [1, 128], strides = [1, 1]} : vector<8x128xf32> to vector<1x128xf32>
    %10 = vector.extract_strided_slice %3 {offsets = [0, 0], sizes = [1, 128], strides = [1, 1]} : vector<16x128xf32> to vector<1x128xf32>
    %11 = vector.extract_strided_slice %3 {offsets = [1, 0], sizes = [1, 128], strides = [1, 1]} : vector<16x128xf32> to vector<1x128xf32>
    %12 = vector.extract_strided_slice %3 {offsets = [2, 0], sizes = [1, 128], strides = [1, 1]} : vector<16x128xf32> to vector<1x128xf32>
    %13 = vector.extract_strided_slice %3 {offsets = [3, 0], sizes = [1, 128], strides = [1, 1]} : vector<16x128xf32> to vector<1x128xf32>
    %cst = arith.constant 1.600000e+01 : f32
    %14 = vector.broadcast %cst : f32 to vector<1x128xf32>
    %15 = arith.mulf %10, %14 : vector<1x128xf32>
    %16 = arith.addf %15, %7 : vector<1x128xf32>
    %cst_6 = arith.constant 1.600000e+01 : f32
    %17 = vector.broadcast %cst_6 : f32 to vector<1x128xf32>
    %18 = arith.mulf %11, %17 : vector<1x128xf32>
    %19 = arith.addf %18, %8 : vector<1x128xf32>
    %20 = arith.mulf %12, %12 : vector<1x128xf32>
    %cst_7 = arith.constant 5.000000e-01 : f32
    %21 = vector.broadcast %cst_7 : f32 to vector<1x128xf32>
    %22 = arith.mulf %20, %21 : vector<1x128xf32>
    %23 = math.floor %22 : vector<1x128xf32>
    %24 = arith.mulf %13, %13 : vector<1x128xf32>
    %cst_8 = arith.constant 5.000000e-01 : f32
    %25 = vector.broadcast %cst_8 : f32 to vector<1x128xf32>
    %26 = arith.mulf %24, %25 : vector<1x128xf32>
    %27 = math.floor %26 : vector<1x128xf32>
    %28 = arith.subf %16, %23 : vector<1x128xf32>
    %29 = arith.subf %19, %27 : vector<1x128xf32>
    %30 = arith.addf %16, %23 : vector<1x128xf32>
    %31 = arith.addf %19, %27 : vector<1x128xf32>
    %32 = vector.extract_strided_slice %4 {offsets = [0, 0], sizes = [1, 128], strides = [1, 1]} : vector<16x128xf32> to vector<1x128xf32>
    %33 = vector.extract_strided_slice %4 {offsets = [1, 0], sizes = [1, 128], strides = [1, 1]} : vector<16x128xf32> to vector<1x128xf32>
    %34 = vector.extract_strided_slice %4 {offsets = [2, 0], sizes = [1, 128], strides = [1, 1]} : vector<16x128xf32> to vector<1x128xf32>
    %35 = vector.extract_strided_slice %4 {offsets = [3, 0], sizes = [1, 128], strides = [1, 1]} : vector<16x128xf32> to vector<1x128xf32>
    %cst_9 = arith.constant 1.600000e+01 : f32
    %36 = vector.broadcast %cst_9 : f32 to vector<1x128xf32>
    %37 = arith.mulf %32, %36 : vector<1x128xf32>
    %38 = arith.addf %37, %7 : vector<1x128xf32>
    %cst_10 = arith.constant 1.600000e+01 : f32
    %39 = vector.broadcast %cst_10 : f32 to vector<1x128xf32>
    %40 = arith.mulf %33, %39 : vector<1x128xf32>
    %41 = arith.addf %40, %8 : vector<1x128xf32>
    %42 = arith.mulf %34, %34 : vector<1x128xf32>
    %cst_11 = arith.constant 5.000000e-01 : f32
    %43 = vector.broadcast %cst_11 : f32 to vector<1x128xf32>
    %44 = arith.mulf %42, %43 : vector<1x128xf32>
    %45 = math.floor %44 : vector<1x128xf32>
    %46 = arith.mulf %35, %35 : vector<1x128xf32>
    %cst_12 = arith.constant 5.000000e-01 : f32
    %47 = vector.broadcast %cst_12 : f32 to vector<1x128xf32>
    %48 = arith.mulf %46, %47 : vector<1x128xf32>
    %49 = math.floor %48 : vector<1x128xf32>
    %50 = arith.subf %38, %45 : vector<1x128xf32>
    %51 = arith.subf %41, %49 : vector<1x128xf32>
    %52 = arith.addf %38, %45 : vector<1x128xf32>
    %53 = arith.addf %41, %49 : vector<1x128xf32>
    %54 = arith.maximumf %28, %50 : vector<1x128xf32>
    %55 = arith.maximumf %29, %51 : vector<1x128xf32>
    %56 = arith.minimumf %30, %52 : vector<1x128xf32>
    %57 = arith.minimumf %31, %53 : vector<1x128xf32>
    %58 = arith.subf %56, %54 : vector<1x128xf32>
    %cst_13 = arith.constant 1.000000e+00 : f32
    %59 = vector.broadcast %cst_13 : f32 to vector<1x128xf32>
    %60 = arith.addf %58, %59 : vector<1x128xf32>
    %cst_14 = arith.constant 0.000000e+00 : f32
    %61 = vector.broadcast %cst_14 : f32 to vector<1x128xf32>
    %62 = arith.maximumf %61, %60 : vector<1x128xf32>
    %63 = arith.subf %57, %55 : vector<1x128xf32>
    %cst_15 = arith.constant 1.000000e+00 : f32
    %64 = vector.broadcast %cst_15 : f32 to vector<1x128xf32>
    %65 = arith.addf %63, %64 : vector<1x128xf32>
    %cst_16 = arith.constant 0.000000e+00 : f32
    %66 = vector.broadcast %cst_16 : f32 to vector<1x128xf32>
    %67 = arith.maximumf %66, %65 : vector<1x128xf32>
    %68 = arith.mulf %62, %67 : vector<1x128xf32>
    %69 = arith.subf %30, %28 : vector<1x128xf32>
    %cst_17 = arith.constant 1.000000e+00 : f32
    %70 = vector.broadcast %cst_17 : f32 to vector<1x128xf32>
    %71 = arith.addf %69, %70 : vector<1x128xf32>
    %72 = arith.subf %31, %29 : vector<1x128xf32>
    %cst_18 = arith.constant 1.000000e+00 : f32
    %73 = vector.broadcast %cst_18 : f32 to vector<1x128xf32>
    %74 = arith.addf %72, %73 : vector<1x128xf32>
    %75 = arith.mulf %71, %74 : vector<1x128xf32>
    %76 = arith.subf %52, %50 : vector<1x128xf32>
    %cst_19 = arith.constant 1.000000e+00 : f32
    %77 = vector.broadcast %cst_19 : f32 to vector<1x128xf32>
    %78 = arith.addf %76, %77 : vector<1x128xf32>
    %79 = arith.subf %53, %51 : vector<1x128xf32>
    %cst_20 = arith.constant 1.000000e+00 : f32
    %80 = vector.broadcast %cst_20 : f32 to vector<1x128xf32>
    %81 = arith.addf %79, %80 : vector<1x128xf32>
    %82 = arith.mulf %78, %81 : vector<1x128xf32>
    %83 = arith.addf %75, %82 : vector<1x128xf32>
    %84 = arith.subf %83, %68 : vector<1x128xf32>
    %85 = arith.divf %68, %84 : vector<1x128xf32>
    %86 = vector.extract_strided_slice %4 {offsets = [4, 0], sizes = [1, 128], strides = [1, 1]} : vector<16x128xf32> to vector<1x128xf32>
    %cst_21 = arith.constant 0.000000e+00 : f32
    %87 = vector.broadcast %cst_21 : f32 to vector<1x128xf32>
    %88 = arith.cmpf ogt, %86, %87 : vector<1x128xf32>
    %89 = arith.cmpf ogt, %85, %85 : vector<1x128xf32>
    %90 = arith.cmpf oeq, %85, %85 : vector<1x128xf32>
    %cst_22 = arith.constant 5.000000e-01 : f32
    %91 = vector.broadcast %cst_22 : f32 to vector<1x128xf32>
    %92 = arith.cmpf ogt, %6, %91 : vector<1x128xf32>
    %93 = arith.andi %90, %92 : vector<1x128xi1>
    %94 = arith.ori %89, %93 : vector<1x128xi1>
    %cst_23 = arith.constant dense<true> : vector<1x128xi1>
    %95 = arith.xori %94, %cst_23 : vector<1x128xi1>
    %96 = arith.andi %88, %95 : vector<1x128xi1>
    %97 = vector.extract_strided_slice %4 {offsets = [4, 0], sizes = [1, 128], strides = [1, 1]} : vector<16x128xf32> to vector<1x128xf32>
    %cst_24 = arith.constant 0.000000e+00 : f32
    %98 = vector.broadcast %cst_24 : f32 to vector<1x128xf32>
    %99 = arith.select %96, %98, %97 : vector<1x128xi1>, vector<1x128xf32>
    %100 = arith.andi %88, %94 : vector<1x128xi1>
    %101 = vector.extract_strided_slice %4 {offsets = [9, 0], sizes = [1, 128], strides = [1, 1]} : vector<16x128xf32> to vector<1x128xf32>
    %cst_25 = arith.constant 0.000000e+00 : f32
    %102 = vector.broadcast %cst_25 : f32 to vector<1x128xf32>
    %103 = arith.select %100, %102, %101 : vector<1x128xi1>, vector<1x128xf32>
    %cst_26 = arith.constant 0.000000e+00 : f32
    %104 = vector.broadcast %cst_26 : f32 to vector<1x128xf32>
    %105 = arith.cmpf ogt, %99, %104 : vector<1x128xf32>
    %106 = arith.extui %105 : vector<1x128xi1> to vector<1x128xi32>
    %107 = arith.sitofp %106 : vector<1x128xi32> to vector<1x128xf32>
    %cst_27 = arith.constant 0.000000e+00 : f32
    %108 = vector.broadcast %cst_27 : f32 to vector<1x128xf32>
    %109 = arith.cmpf ogt, %103, %108 : vector<1x128xf32>
    %110 = arith.extui %109 : vector<1x128xi1> to vector<1x128xi32>
    %111 = arith.sitofp %110 : vector<1x128xi32> to vector<1x128xf32>
    %cst_28 = arith.constant 0.000000e+00 : f32
    %112 = vector.broadcast %cst_28 : f32 to vector<1x128xf32>
    %113 = arith.cmpf oeq, %99, %112 : vector<1x128xf32>
    %cst_29 = arith.constant 0.000000e+00 : f32
    %114 = vector.broadcast %cst_29 : f32 to vector<1x128xf32>
    %115 = arith.cmpf oeq, %103, %114 : vector<1x128xf32>
    %116 = arith.andi %113, %115 : vector<1x128xi1>
    %117 = arith.extui %116 : vector<1x128xi1> to vector<1x128xi32>
    %118 = arith.sitofp %117 : vector<1x128xi32> to vector<1x128xf32>
    %119 = arith.mulf %118, %9 : vector<1x128xf32>
    %120 = vector.extract_strided_slice %3 {offsets = [0, 0], sizes = [4, 128], strides = [1, 1]} : vector<16x128xf32> to vector<4x128xf32>
    %121 = vector.extract_strided_slice %4 {offsets = [0, 0], sizes = [4, 128], strides = [1, 1]} : vector<16x128xf32> to vector<4x128xf32>
    %122 = arith.subf %120, %121 : vector<4x128xf32>
    %123 = arith.mulf %122, %122 : vector<4x128xf32>
    %cst_30 = arith.constant dense<0.000000e+00> : vector<128xf32>
    %124 = vector.multi_reduction <add>, %123, %cst_30 [0] : vector<4x128xf32> to vector<128xf32>
    %125 = vector.shape_cast %124 : vector<128xf32> to vector<1x128xf32>
    %126 = vector.extract_strided_slice %3 {offsets = [5, 0], sizes = [4, 128], strides = [1, 1]} : vector<16x128xf32> to vector<4x128xf32>
    %127 = vector.extract_strided_slice %4 {offsets = [5, 0], sizes = [4, 128], strides = [1, 1]} : vector<16x128xf32> to vector<4x128xf32>
    %128 = arith.subf %126, %127 : vector<4x128xf32>
    %129 = arith.mulf %128, %128 : vector<4x128xf32>
    %cst_31 = arith.constant dense<0.000000e+00> : vector<128xf32>
    %130 = vector.multi_reduction <add>, %129, %cst_31 [0] : vector<4x128xf32> to vector<128xf32>
    %131 = vector.shape_cast %130 : vector<128xf32> to vector<1x128xf32>
    %132 = vector.extract_strided_slice %3 {offsets = [10, 0], sizes = [6, 128], strides = [1, 1]} : vector<16x128xf32> to vector<6x128xf32>
    %133 = vector.extract_strided_slice %4 {offsets = [10, 0], sizes = [6, 128], strides = [1, 1]} : vector<16x128xf32> to vector<6x128xf32>
    %134 = arith.subf %132, %133 : vector<6x128xf32>
    %135 = arith.mulf %134, %134 : vector<6x128xf32>
    %cst_32 = arith.constant dense<0.000000e+00> : vector<128xf32>
    %136 = vector.multi_reduction <add>, %135, %cst_32 [0] : vector<6x128xf32> to vector<128xf32>
    %137 = vector.shape_cast %136 : vector<128xf32> to vector<1x128xf32>
    %138 = vector.extract_strided_slice %3 {offsets = [4, 0], sizes = [1, 128], strides = [1, 1]} : vector<16x128xf32> to vector<1x128xf32>
    %139 = arith.subf %138, %99 : vector<1x128xf32>
    %140 = arith.mulf %139, %139 : vector<1x128xf32>
    %141 = vector.extract_strided_slice %3 {offsets = [9, 0], sizes = [1, 128], strides = [1, 1]} : vector<16x128xf32> to vector<1x128xf32>
    %142 = arith.subf %141, %103 : vector<1x128xf32>
    %143 = arith.mulf %142, %142 : vector<1x128xf32>
    %144 = arith.mulf %107, %125 : vector<1x128xf32>
    %c0_33 = arith.constant 0 : index
    %c0_34 = arith.constant 0 : index
    %145 = vector.load %arg5[%c0_33, %c0_34] : memref<16x128xf32, #tpu.memory_space<vmem>>, vector<1x128xf32>
    tpu.vector_store %arg5[%c0_33, %c0_34], %144 {strides = array<i32>} : memref<16x128xf32, #tpu.memory_space<vmem>>, vector<1x128xf32>,
    %146 = arith.mulf %111, %131 : vector<1x128xf32>
    %c1 = arith.constant 1 : index
    %c0_35 = arith.constant 0 : index
    %147 = vector.load %arg5[%c1, %c0_35] : memref<16x128xf32, #tpu.memory_space<vmem>>, vector<1x128xf32>
    tpu.vector_store %arg5[%c1, %c0_35], %146 {strides = array<i32>} : memref<16x128xf32, #tpu.memory_space<vmem>>, vector<1x128xf32>,
    %148 = arith.mulf %107, %140 : vector<1x128xf32>
    %c2 = arith.constant 2 : index
    %c0_36 = arith.constant 0 : index
    %149 = vector.load %arg5[%c2, %c0_36] : memref<16x128xf32, #tpu.memory_space<vmem>>, vector<1x128xf32>
    tpu.vector_store %arg5[%c2, %c0_36], %148 {strides = array<i32>} : memref<16x128xf32, #tpu.memory_space<vmem>>, vector<1x128xf32>,
    %150 = arith.mulf %111, %143 : vector<1x128xf32>
    %c3 = arith.constant 3 : index
    %c0_37 = arith.constant 0 : index
    %151 = vector.load %arg5[%c3, %c0_37] : memref<16x128xf32, #tpu.memory_space<vmem>>, vector<1x128xf32>
    tpu.vector_store %arg5[%c3, %c0_37], %150 {strides = array<i32>} : memref<16x128xf32, #tpu.memory_space<vmem>>, vector<1x128xf32>,
    %152 = arith.mulf %107, %137 : vector<1x128xf32>
    %c4 = arith.constant 4 : index
    %c0_38 = arith.constant 0 : index
    %153 = vector.load %arg5[%c4, %c0_38] : memref<16x128xf32, #tpu.memory_space<vmem>>, vector<1x128xf32>
    tpu.vector_store %arg5[%c4, %c0_38], %152 {strides = array<i32>} : memref<16x128xf32, #tpu.memory_space<vmem>>, vector<1x128xf32>,
    %154 = arith.mulf %111, %137 : vector<1x128xf32>
    %c5 = arith.constant 5 : index
    %c0_39 = arith.constant 0 : index
    %155 = vector.load %arg5[%c5, %c0_39] : memref<16x128xf32, #tpu.memory_space<vmem>>, vector<1x128xf32>
    tpu.vector_store %arg5[%c5, %c0_39], %154 {strides = array<i32>} : memref<16x128xf32, #tpu.memory_space<vmem>>, vector<1x128xf32>,
    %156 = arith.mulf %119, %140 : vector<1x128xf32>
    %c6 = arith.constant 6 : index
    %c0_40 = arith.constant 0 : index
    %157 = vector.load %arg5[%c6, %c0_40] : memref<16x128xf32, #tpu.memory_space<vmem>>, vector<1x128xf32>
    tpu.vector_store %arg5[%c6, %c0_40], %156 {strides = array<i32>} : memref<16x128xf32, #tpu.memory_space<vmem>>, vector<1x128xf32>,
    %158 = arith.mulf %119, %143 : vector<1x128xf32>
    %c7 = arith.constant 7 : index
    %c0_41 = arith.constant 0 : index
    %159 = vector.load %arg5[%c7, %c0_41] : memref<16x128xf32, #tpu.memory_space<vmem>>, vector<1x128xf32>
    tpu.vector_store %arg5[%c7, %c0_41], %158 {strides = array<i32>} : memref<16x128xf32, #tpu.memory_space<vmem>>, vector<1x128xf32>,
    %c8 = arith.constant 8 : index
    %c0_42 = arith.constant 0 : index
    %160 = vector.load %arg5[%c8, %c0_42] : memref<16x128xf32, #tpu.memory_space<vmem>>, vector<1x128xf32>
    tpu.vector_store %arg5[%c8, %c0_42], %107 {strides = array<i32>} : memref<16x128xf32, #tpu.memory_space<vmem>>, vector<1x128xf32>,
    %c9 = arith.constant 9 : index
    %c0_43 = arith.constant 0 : index
    %161 = vector.load %arg5[%c9, %c0_43] : memref<16x128xf32, #tpu.memory_space<vmem>>, vector<1x128xf32>
    tpu.vector_store %arg5[%c9, %c0_43], %111 {strides = array<i32>} : memref<16x128xf32, #tpu.memory_space<vmem>>, vector<1x128xf32>,
    %c10 = arith.constant 10 : index
    %c0_44 = arith.constant 0 : index
    %162 = vector.load %arg5[%c10, %c0_44] : memref<16x128xf32, #tpu.memory_space<vmem>>, vector<1x128xf32>
    tpu.vector_store %arg5[%c10, %c0_44], %119 {strides = array<i32>} : memref<16x128xf32, #tpu.memory_space<vmem>>, vector<1x128xf32>,
    %c0_45 = arith.constant 0 : index
    %c0_46 = arith.constant 0 : index
    %163 = vector.load %arg4[%c0_45, %c0_46] : memref<16x1xf32, #tpu.memory_space<vmem>>, vector<16x1xf32>
    %c0_47 = arith.constant 0 : index
    %c0_48 = arith.constant 0 : index
    %164 = vector.load %arg5[%c0_47, %c0_48] : memref<16x128xf32, #tpu.memory_space<vmem>>, vector<16x128xf32>
    %cst_49 = arith.constant dense<0.000000e+00> : vector<16xf32>
    %165 = vector.multi_reduction <add>, %164, %cst_49 [1] : vector<16x128xf32> to vector<16xf32>
    %166 = vector.shape_cast %165 : vector<16xf32> to vector<16x1xf32>
    %167 = arith.addf %163, %166 : vector<16x1xf32>
    %c0_50 = arith.constant 0 : index
    %c0_51 = arith.constant 0 : index
    %168 = vector.load %arg4[%c0_50, %c0_51] : memref<16x1xf32, #tpu.memory_space<vmem>>, vector<16x1xf32>
    tpu.vector_store %arg4[%c0_50, %c0_51], %167 {strides = array<i32>} : memref<16x1xf32, #tpu.memory_space<vmem>>, vector<16x1xf32>,
    return
  }
  func.func @transform_0(%arg0: i32) -> (i32, i32) {
    %c0_i32 = arith.constant 0 : i32
    %c0_i32_0 = arith.constant 0 : i32
    return %c0_i32, %arg0 : i32, i32
  }
  func.func @transform_1(%arg0: i32) -> (i32, i32) {
    %c0_i32 = arith.constant 0 : i32
    %c0_i32_0 = arith.constant 0 : i32
    return %c0_i32, %arg0 : i32, i32
  }
  func.func @transform_2(%arg0: i32) -> (i32, i32) {
    %c0_i32 = arith.constant 0 : i32
    %c0_i32_0 = arith.constant 0 : i32
    return %c0_i32, %arg0 : i32, i32
  }
  func.func @transform_3(%arg0: i32) -> (i32, i32) {
    %c0_i32 = arith.constant 0 : i32
    %c0_i32_0 = arith.constant 0 : i32
    %c0_i32_1 = arith.constant 0 : i32
    return %c0_i32, %c0_i32_0 : i32, i32
  }
}

</mosaic_0001>

<bundles_post_ra>
// kernel: tpu_custom_call.1
= control target key start
LH: loop header
LB: loop body
LE: loop exit
PB: predicated region body
PF: predicated region fallthrough
CT: control target
= control target key end

     0   :  { %8 = vsyncpa [#allocation4], 0  ;;  %s490_s0 = inlined_call_operand.hbm [shape: f32[16,128], index: 0, kind: input, shape index: {}]   ;;  %s491_s1 = inlined_call_operand.hbm [shape: f32[16,128], index: 1, kind: input, shape index: {}]   ;;  %s492_s2 = inlined_call_operand.hbm [shape: f32[8,128], index: 2, kind: input, shape index: {}]   ;;  %s493_s3 = inlined_call_operand.hbm [shape: f32[16,1], index: 3, kind: output, shape index: {}]  }
   0x1   :  { %9 = vsyncpa [#allocation7], 0 }
   0x2   :  { %10 = vsyncpa [#allocation5], 0  ;;  %s354_s12 = smov [#allocation6]   ;;  %s355_s14 = smov [#allocation3]  }
   0x3   :  { %s28_s13 = sshll.u32 %s354_s12, 4  ;;  %s16_s15 = sshll.u32 %s355_s14, 4  ;;  %s29_s13 = int_to_ptr.vmem [resolvable:$true] %s28_s13  ;;  %s383_s15 = int_to_ptr.vmem [resolvable:$true] %s16_s15 }
   0x4   :  { %s260_s18 = scalar_lea.hbm %s491_s1, 256 }
   0x5   :  { %p261_p0 = scmp.ne.s32.totalorder %s491_s1, %s260_s18  ;;  %p264_p1 = scmp.lt.u32.totalorder %s260_s18, %s491_s1 }
   0x7   :  { %p266_p2 = pnand %p264_p1, %p261_p0 }
   0x9   :  { %269 = shalt.err (!%p266_p2)
}
   0xa   :  { %s270_s23 = scalar_lea.vmem %s29_s13, 256  ;;  %p275_p4 = scmp.lt.s32.totalorder %s29_s13, %s29_s13 }
   0xb   :  { %p271_p3 = scmp.ne.s32.totalorder %s29_s13, %s270_s23  ;;  %p276_p5 = scmp.lt.s32.totalorder %s270_s23, %s270_s23 }
   0xd   :  { %p277_p6 = por %p276_p5, %p275_p4 }
   0xf   :  { %p278_p7 = pnand %p277_p6, %p271_p3 }
  0x11   :  { %281 = shalt.err (!%p278_p7)
}
  0x12   :  { %s356_s24 = smov 128   ;;  %s357_s25 = smov 8  }
  0x13   :  { %34 = dma.hbm_to_vmem [thread:$0]  %s491_s1, 256, %s29_s13, [#allocation7], %s356_s24, %s356_s24, %s357_s25  }
  0x14   :  { %s282_s30 = scalar_lea.hbm %s490_s0, 256 }
  0x15   :  { %p283_p8 = scmp.ne.s32.totalorder %s490_s0, %s282_s30  ;;  %p286_p9 = scmp.lt.u32.totalorder %s282_s30, %s490_s0 }
  0x17   :  { %p288_p10 = pnand %p286_p9, %p283_p8 }
  0x19   :  { %291 = shalt.err (!%p288_p10)
}
  0x1a   :  { %s292_s8 = scalar_lea.vmem %s383_s15, 256  ;;  %p297_p12 = scmp.lt.s32.totalorder %s383_s15, %s383_s15 }
  0x1b   :  { %p293_p11 = scmp.ne.s32.totalorder %s383_s15, %s292_s8  ;;  %p298_p13 = scmp.lt.s32.totalorder %s292_s8, %s292_s8 }
  0x1d   :  { %p299_p0 = por %p298_p13, %p297_p12 }
  0x1f   :  { %p300_p1 = pnand %p299_p0, %p293_p11 }
  0x21   :  { %303 = shalt.err (!%p300_p1)
}
  0x22   :  { %22 = dma.hbm_to_vmem [thread:$0]  %s490_s0, 256, %s383_s15, [#allocation4], %s356_s24, %s356_s24, %s357_s25  }
  0x23   :  { %s358_s10 = smov [#allocation8]   ;;  %s304_s14 = scalar_lea.hbm %s492_s2, 128 }
  0x24   :  { %s41_s11 = sshll.u32 %s358_s10, 4  ;;  %p305_p2 = scmp.ne.s32.totalorder %s492_s2, %s304_s14  ;;  %s42_s11 = int_to_ptr.vmem [resolvable:$true] %s41_s11 }
  0x25   :  { %p308_p3 = scmp.lt.u32.totalorder %s304_s14, %s492_s2 }
  0x27   :  { %p310_p4 = pnand %p308_p3, %p305_p2 }
  0x29   :  { %313 = shalt.err (!%p310_p4)
}
  0x2a   :  { %s314_s20 = scalar_lea.vmem %s42_s11, 128  ;;  %p319_p6 = scmp.lt.s32.totalorder %s42_s11, %s42_s11 }
  0x2b   :  { %p315_p5 = scmp.ne.s32.totalorder %s42_s11, %s314_s20  ;;  %p320_p7 = scmp.lt.s32.totalorder %s314_s20, %s314_s20 }
  0x2d   :  { %p321_p8 = por %p320_p7, %p319_p6 }
  0x2f   :  { %p322_p9 = pnand %p321_p8, %p315_p5 }
  0x31   :  { %325 = shalt.err (!%p322_p9)
}
  0x32   :  { %44 = dma.hbm_to_vmem [thread:$0]  %s492_s2, 128, %s42_s11, [#allocation7]  }
  0x33   :  { %348 = dma.done.wait [#allocation4], 256  }
  0x34   :  { %349 = vsyncadd [#allocation4], 4294967040 }
  0x35   :  { %350 = dma.done.wait [#allocation7], 384  }
  0x36   :  { %351 = vsyncadd [#allocation7], 4294966912  ;;  %v359_v0 = vmov 0.0   ;;  %vm58_vm0 = vcmask 7168   ;;  %v438_v1 = vld [vmem:[#allocation3] sm:$0xff]  ;;  %v440_v2 = vld [vmem:[#allocation6] sm:$0xff] }
  0x37   :  { %61 = vst [vmem:[#allocation2] sm:$0xff] %v359_v0  ;;  %62 = vst [vmem:[#allocation2 + $0x8] sm:$0xff] %v359_v0  ;;  %v442_v3 = vld [vmem:[#allocation8] sm:$0xff]  ;;  %v68_v4 = vmul.f32 16.0, %v438_v1  ;;  %v73_v5 = vmul.f32 %v438_v1, %v438_v1  ;;  %v81_v6 = vmul.f32 16.0, %v440_v2  ;;  %v83_v7 = vmul.f32 %v440_v2, %v440_v2  ;;  %v451_v9 = vld [vmem:[#allocation3 + $0x8] sm:$0xff] }
  0x38   :  { %59 = vst.msk [vmem:[#allocation9] sm:$0xff] %vm58_vm0, %v359_v0  ;;  %60 = vst.msk [vmem:[#allocation9 + $0x8] sm:$0xff] %vm58_vm0, %v359_v0  ;;  %v70_v8 = vrot.slane %v442_v3, 1  ;;  %v453_v10 = vld [vmem:[#allocation6 + $0x8] sm:$0xff]  ;;  %v150_v17 = vsub.f32 %v438_v1, %v440_v2  ;;  %vm164_vm1 = vcmask 1042432   ;;  %vm152_vm2 = vcmask 1043456  }
  0x39   :  { %v74_v11 = vmul.f32 0.5, %v73_v5  ;;  %v84_v12 = vmul.f32 0.5, %v83_v7  ;;  %v160_v18 = vsub.f32 %v451_v9, %v453_v10  ;;  %vm178_vm3 = vcmask 1045504   ;;  %s362_s2 = smov [#allocation9]  }
  0x3a   :  { %v72_v13 = vadd.f32 %v70_v8, %v68_v4  ;;  %v82_v15 = vadd.f32 %v81_v6, %v70_v8  ;;  %v151_v25 = vmul.f32 %v150_v17, %v150_v17  ;;  %vm119_vm4 = vcmp.gt.f32.partialorder %v442_v3, 0.5  ;;  %s233_s21 = sshll.u32 %s362_s2, 4  ;;  %s234_s21 = int_to_ptr.vmem [resolvable:$true] %s233_s21 }
  0x3b   :  { %v75_v14 = vfloor.f32 %v74_v11  ;;  %v85_v16 = vfloor.f32 %v84_v12  ;;  %v161_v26 = vmul.f32 %v160_v18, %v160_v18  ;;  %vm116_vm7 = vcmp.gt.f32.partialorder %v440_v2, 0.0  ;;  %s326_s22 = scalar_lea.vmem %s234_s21, 256  ;;  %p331_p11 = scmp.lt.s32.totalorder %s234_s21, %s234_s21 }
  0x3c   :  { %v165_v34 = vrot.slane %v151_v25, 5  ;;  %v153_v49 = vsel %vm152_vm2, %v151_v25, 0.0  ;;  %vm360_vm8 = vmmov 1   ;;  %v361_v5 = vmov 0   ;;  %p327_p10 = scmp.ne.s32.totalorder %s234_s21, %s326_s22  ;;  %p332_p12 = scmp.lt.s32.totalorder %s326_s22, %s326_s22 }
  0x3d   :  { %v77_v19 = vrot.slane %v75_v14, 2  ;;  %v87_v20 = vrot.slane %v85_v16, 2  ;;  %v166_v35 = vrot.slane %v161_v26, 5  ;;  %v176_v42 = vrot.slane %v161_v26, 2 }
  0x3e   :  { %v154_v53 = vrot.slane %v153_v49, 4  ;;  %p333_p13 = por %p332_p12, %p331_p11 }
  0x3f   :  { %v79_v21 = vsub.f32 %v72_v13, %v77_v19  ;;  %v80_v22 = vadd.f32 %v77_v19, %v72_v13  ;;  %v89_v23 = vsub.f32 %v82_v15, %v87_v20  ;;  %v90_v24 = vadd.f32 %v87_v20, %v82_v15 }
  0x40   :  { %v167_v43 = vsel %vm164_vm1, %v165_v34, %v166_v35  ;;  %v179_v48 = vsel %vm178_vm3, %v176_v42, 0.0  ;;  %v155_v56 = vadd.f32 %v154_v53, %v153_v49  ;;  %v133_v13 = vrot.slane %v453_v10, 5  ;;  %p334_p0 = pnand %p333_p13, %p327_p10 }
  0x41   :  { %v91_v27 = vmax.f32 %v79_v21, %v89_v23  ;;  %v92_v28 = vmin.f32 %v80_v22, %v90_v24  ;;  %v100_v29 = vsub.f32 %v80_v22, %v79_v21  ;;  %v106_v30 = vsub.f32 %v90_v24, %v89_v23 }
  0x42   :  { %v169_v47 = vsel %vm152_vm2, %v167_v43, 0.0  ;;  %v180_v52 = vrot.slane %v179_v48, 4  ;;  %v156_v59 = vrot.slane %v155_v56, 2  ;;  %v147_v19 = vrot.slane %v442_v3, 7 }
  0x43   :  { %v93_v31 = vsub.f32 %v92_v28, %v91_v27  ;;  %v101_v32 = vadd.f32 1.0, %v100_v29  ;;  %v107_v33 = vadd.f32 1.0, %v106_v30  ;;  %v170_v51 = vrot.slane %v169_v47, 4 }
  0x44   :  { %v181_v55 = vadd.f32 %v180_v52, %v179_v48  ;;  %v157_v4 = vadd.f32 %v156_v59, %v155_v56 }
  0x45   :  { %v94_v36 = vadd.f32 1.0, %v93_v31  ;;  %v103_v37 = vrot.slane %v101_v32, 1  ;;  %v109_v38 = vrot.slane %v107_v33, 1  ;;  %v171_v54 = vadd.f32 %v170_v51, %v169_v47 }
  0x46   :  { %v182_v58 = vrot.slane %v181_v55, 2  ;;  %v158_v14 = vrot.slane %v157_v4, 1 }
  0x47   :  { %v95_v39 = vmax.f32 %v94_v36, 0.0  ;;  %v105_v40 = vmul.f32 %v103_v37, %v101_v32  ;;  %v111_v41 = vmul.f32 %v109_v38, %v107_v33  ;;  %v172_v57 = vrot.slane %v171_v54, 2  ;;  %v215_v36 = vld [vmem:[#allocation9] sm:$0xff] }
  0x48   :  { %v183_v63 = vadd.f32 %v182_v58, %v181_v55  ;;  %v159_v20 = vadd.f32 %v158_v14, %v157_v4 }
  0x49   :  { %v97_v44 = vrot.slane %v95_v39, 1  ;;  %v112_v45 = vadd.f32 %v111_v41, %v105_v40  ;;  %v173_v62 = vadd.f32 %v172_v57, %v171_v54 }
  0x4a   :  { %v184_v8 = vrot.slane %v183_v63, 1 }
  0x4b   :  { %v99_v46 = vmul.f32 %v97_v44, %v95_v39  ;;  %v174_v7 = vrot.slane %v173_v62, 1  ;;  %v216_v39 = vld [vmem:[#allocation9 + $0x8] sm:$0xff] }
  0x4c   :  { %v185_v17 = vadd.f32 %v184_v8, %v183_v63 }
  0x4d   :  { %v113_v50 = vsub.f32 %v112_v45, %v99_v46  ;;  %v175_v16 = vadd.f32 %v174_v7, %v173_v62 }
  0x4f   :  { %258 = vrcp.f32 %v113_v50 }
  0x59   :  { %v259_v60 = vpop.eup %258 }
  0x5a   :  { %v115_v61 = vmul.f32 %v259_v60, %v99_v46 }
  0x5c   :  { %vm118_vm5 = vcmp.eq.f32.partialorder %v115_v61, %v115_v61 }
  0x5d   :  { %vm120_vm6 = vmand %vm118_vm5, %vm119_vm4 }
  0x5e   :  { %vm122_vm9 = vmxor %vm120_vm6, %vm360_vm8  ;;  %v128_v6 = vsel %vm120_vm6, 1, %v361_v5 }
  0x5f   :  { %v123_v11 = vsel %vm122_vm9, 1, %v361_v5  ;;  %v129_v12 = vrot.slane %v128_v6, 4 }
  0x60   :  { %v124_v15 = vrot.slane %v123_v11, 4 }
  0x61   :  { %vm130_vm10 = vcmp.ne.s32.totalorder %v129_v12, 0 }
  0x62   :  { %vm125_vm11 = vcmp.ne.s32.totalorder %v124_v15, 0  ;;  %vm131_vm12 = vmand %vm116_vm7, %vm130_vm10 }
  0x63   :  { %vm126_vm13 = vmand %vm116_vm7, %vm125_vm11  ;;  %v135_v18 = vsel %vm131_vm12, 0.0, %v133_v13 }
  0x64   :  { %v127_v21 = vsel %vm126_vm13, 0.0, %v440_v2  ;;  %vm139_vm14 = vcmp.gt.f32.partialorder %v135_v18, 0.0  ;;  %vm143_vm15 = vcmp.eq.f32.partialorder %v135_v18, 0.0  ;;  %v189_v10 = vrot.slane %v135_v18, 3 }
  0x65   :  { %vm136_vm1 = vcmp.gt.f32.partialorder %v127_v21, 0.0  ;;  %v247_v22 = vsel %vm139_vm14, 1.0, %v359_v0  ;;  %vm142_vm2 = vcmp.eq.f32.partialorder %v127_v21, 0.0  ;;  %v186_v23 = vsub.f32 %v438_v1, %v127_v21 }
  0x66   :  { %v246_v24 = vsel %vm136_vm1, 1.0, %v359_v0  ;;  %vm144_vm3 = vmand %vm142_vm2, %vm143_vm15  ;;  %v191_v25 = vsub.f32 %v451_v9, %v189_v10  ;;  %v195_v26 = vmul.f32 %v247_v22, %v175_v16  ;;  %v206_v27 = vmul.f32 %v247_v22, %v185_v17  ;;  %213 = vst [vmem:[#allocation2 + $0x5] sm:$0x10] %v247_v22 }
  0x67   :  { %v248_v3 = vsel %vm144_vm3, 1.0, %v359_v0  ;;  %v187_v2 = vmul.f32 %v186_v23, %v186_v23  ;;  %v193_v28 = vmul.f32 %v246_v24, %v159_v20  ;;  %v204_v29 = vmul.f32 %v246_v24, %v185_v17  ;;  %212 = vst [vmem:[#allocation2 + $0x4] sm:$0x10] %v246_v24 }
  0x68   :  { %v149_v30 = vmul.f32 %v248_v3, %v147_v19  ;;  %v192_v31 = vmul.f32 %v191_v25, %v191_v25  ;;  %196 = vst [vmem:[#allocation2 - $0x3] sm:$0x10] %v195_v26  ;;  %207 = vst [vmem:[#allocation2 + $0x1] sm:$0x10] %v206_v27 }
  0x69   :  { %194 = vst [vmem:[#allocation2 - $0x4] sm:$0x10] %v193_v28  ;;  %v197_v1 = vmul.f32 %v246_v24, %v187_v2  ;;  %205 = vst [vmem:[#allocation2] sm:$0x10] %v204_v29 }
  0x6a   :  { %v200_v32 = vrot.slane %v192_v31, 5  ;;  %v208_v33 = vmul.f32 %v187_v2, %v149_v30  ;;  %214 = vst [vmem:[#allocation2 + $0x6] sm:$0x10] %v149_v30 }
  0x6b   :  { %198 = vst [vmem:[#allocation2 - $0x2] sm:$0x10] %v197_v1 }
  0x6c   :  { %v202_v9 = vmul.f32 %v247_v22, %v200_v32  ;;  %209 = vst [vmem:[#allocation2 + $0x2] sm:$0x10] %v208_v33  ;;  %v210_v34 = vmul.f32 %v200_v32, %v149_v30 }
  0x6e   :  { %203 = vst [vmem:[#allocation2 - $0x1] sm:$0x10] %v202_v9  ;;  %211 = vst [vmem:[#allocation2 + $0x3] sm:$0x10] %v210_v34 }
  0x71   :  { %v218_v35 = vld [vmem:[#allocation2 + $0x8] sm:$0xff] }
  0x75   :  { %v217_v0 = vld [vmem:[#allocation2] sm:$0xff] }
  0x76   :  { %219 = vadd.xlane.f32.xlu0 %v217_v0 }
  0x7a   :  { %221 = vadd.xlane.f32.xlu0 %v218_v35 }
 0x103   :  { %v220_v37 = vpop.xlane.xlu0 %219 }
 0x104   :  { %v223_v38 = vadd.f32 %v220_v37, %v215_v36 }
 0x106   :  { %226 = vst.msk [vmem:[#allocation9] sm:$0xff] %vm58_vm0, %v223_v38 }
 0x107   :  { %v222_v40 = vpop.xlane.xlu0 %221 }
 0x108   :  { %v224_v41 = vadd.f32 %v222_v40, %v216_v39 }
 0x10a   :  { %227 = vst.msk [vmem:[#allocation9 + $0x8] sm:$0xff] %vm58_vm0, %v224_v41 }
 0x10b   :  { %337 = shalt.err (!%p334_p0)
}
 0x10c   :  { %s338_s27 = scalar_lea.hbm %s493_s3, 256 }
 0x10d   :  { %p339_p1 = scmp.ne.s32.totalorder %s493_s3, %s338_s27  ;;  %p342_p2 = scmp.lt.u32.totalorder %s338_s27, %s493_s3 }
 0x10f   :  { %p344_p3 = pnand %p342_p2, %p339_p1 }
 0x111   :  { %347 = shalt.err (!%p344_p3)
}
 0x112   :  { %239 = dma.vmem_to_hbm [thread:$0]  %s234_s21, 256, %s493_s3, [#allocation5], %s356_s24, %s356_s24, %s357_s25  }
 0x113   :  { %352 = dma.done.wait [#allocation5], 256  }
 0x114   :  { %353 = vsyncadd [#allocation5], 4294967040 }
 0x115   :  { %243 = vsyncpa [#allocation4], 1 }
 0x116   :  { %244 = vsyncpa [#allocation7], 1 }
 0x117   :  { %245 = vsyncpa [#allocation5], 1 }

</bundles_post_ra>
